<compile_context>
chip_gen: v7x
topology: tpu7x:2x2x1
jax: 0.10.0
libtpu: 0.0.40
codegen_flags: <defaults>
</compile_context>

<pallas_src>
import jax
import jax.numpy as jnp
from jax.experimental import pallas as pl
from jax.experimental.pallas import tpu as pltpu

EPS = 1e-5
LANE = 128
NEG_BIG = -1e30


def _round_up(n, m):
    return ((n + m - 1) // m) * m


# --------------------------------------------------------------------------------------
# Kernel
# --------------------------------------------------------------------------------------
def mlp4_kernel(x_ref,
                w1_ref, g1_ref, be1_ref,
                w2_ref, g2_ref, be2_ref,
                w3_ref, g3_ref, be3_ref,
                w4_ref, g4_ref, be4_ref,
                w5_ref, b5_ref,
                o_ref):
    n_inv = 1.0 / x_ref.shape[0]  # static real batch size (no batch padding here)

    def fc_bn_relu(h, w_ref, g_ref, be_ref):
        # Linear, bias dropped (cancels exactly under training-mode BN). bf16 x bf16 -> f32 acc.
        z = jnp.dot(h, w_ref[...], preferred_element_type=jnp.float32)
        # BatchNorm1d (training-mode batch stats, biased variance), one pass sum/sumsq,
        # folded into a single FMA per element. All stats math in f32.
        mean = jnp.sum(z, axis=0, keepdims=True) * n_inv
        ex2 = jnp.sum(z * z, axis=0, keepdims=True) * n_inv
        var = ex2 - mean * mean
        scale = g_ref[...] * jax.lax.rsqrt(var + EPS)   # EUP rsqrt
        shift = be_ref[...] - mean * scale
        # ReLU (Dropout is identity). Cast back to bf16 for the next MXU matmul.
        return jnp.maximum(z * scale + shift, 0.0).astype(jnp.bfloat16)

    h = fc_bn_relu(x_ref[...], w1_ref, g1_ref, be1_ref)
    h = fc_bn_relu(h, w2_ref, g2_ref, be2_ref)
    h = fc_bn_relu(h, w3_ref, g3_ref, be3_ref)
    h = fc_bn_relu(h, w4_ref, g4_ref, be4_ref)

    # fc5 + softmax. Padded logit lanes already carry -1e30 via the pre-baked b5,
    # so they vanish in the softmax with no in-kernel masking.
    logits = jnp.dot(h, w5_ref[...], preferred_element_type=jnp.float32) + b5_ref[...]
    m = jnp.max(logits, axis=-1, keepdims=True)
    e = jnp.exp(logits - m)
    inv = pl.reciprocal(jnp.sum(e, axis=-1, keepdims=True), approx=True)  # EUP, ~free
    o_ref[...] = (e * inv).astype(o_ref.dtype)


# --------------------------------------------------------------------------------------
# Parameter preparation (done ONCE, outside the per-call path)
# --------------------------------------------------------------------------------------
def prepare_params(params, input_dim, hidden_dim, output_dim):
    """Transpose Linear weights to [D_in, D_out], zero-pad feature dims to x128, cast to bf16.

    fc biases 1-4 are intentionally dropped (no-ops under training-mode BatchNorm).
    b5's padded lanes are set to -1e30 so the padded softmax columns get zero probability.
    """
    din_p = _round_up(input_dim, LANE)
    dh_p = _round_up(hidden_dim, LANE)
    dout_p = _round_up(output_dim, LANE)

    def padw(w, rows, cols):
        wt = w.T
        wt = jnp.pad(wt, ((0, rows - wt.shape[0]), (0, cols - wt.shape[1])))
        return wt.astype(jnp.bfloat16)

    def pad_row(a, cols, fill=0.0):
        a = a.reshape(1, -1).astype(jnp.float32)
        return jnp.pad(a, ((0, 0), (0, cols - a.shape[1])), constant_values=fill)

    pp = {
        "out_dim": output_dim,
        "din_p": din_p,
        "dh_p": dh_p,
        "dout_p": dout_p,
        "w1t": padw(params["w1"], din_p, dh_p),
        "g1": pad_row(params["gamma1"], dh_p),   # padded gamma lanes are 0 -> padded cols stay 0
        "be1": pad_row(params["beta1"], dh_p),
        "w5t": padw(params["w5"], dh_p, dout_p),
        "b5": pad_row(params["b5"], dout_p, fill=NEG_BIG),  # pre-baked softmax mask
    }
    for i in (2, 3, 4):
        pp[f"w{i}t"] = padw(params[f"w{i}"], dh_p, dh_p)
        pp[f"g{i}"] = pad_row(params[f"gamma{i}"], dh_p)
        pp[f"be{i}"] = pad_row(params[f"beta{i}"], dh_p)
    return pp


def _vmem_limit_bytes(B, din_p, dh_p, dout_p):
    """Size the scoped-VMEM limit from the actual resident footprint of the no-grid kernel."""
    weights = 2 * (din_p * dh_p + 3 * dh_p * dh_p + dh_p * dout_p)   # bf16 weights
    vectors = 4 * (8 * dh_p + dout_p)                                # gamma/beta/b5 (f32)
    io = 2 * B * din_p + 4 * B * dout_p                              # x bf16 in, out f32
    live = 4 * B * dh_p * 4                                          # ~4 live f32 [B, dh_p] temps
    est = int(1.5 * (weights + vectors + io + live)) + (2 << 20)
    # Cap at 64 MiB = v7x physical VMEM; raise above the 16/32 MiB scoped defaults when needed.
    return min(max(est, 32 << 20), 64 << 20)


# --------------------------------------------------------------------------------------
# Forward wrapper
# --------------------------------------------------------------------------------------
def mlp_4layers_forward(x, pp):
    """x: [B, input_dim] float32, pp: output of prepare_params."""
    B = x.shape[0]
    din_p, dh_p, dout_p = pp["din_p"], pp["dh_p"], pp["dout_p"]
    out_dim = pp["out_dim"]

    if x.shape[1] != din_p:  # pad input features to the padded K of w1t
        x = jnp.pad(x, ((0, 0), (0, din_p - x.shape[1])))
    x = x.astype(jnp.bfloat16)  # MXU-native operand; halves input DMA bytes

    vmem = pl.BlockSpec(memory_space=pltpu.MemorySpace.VMEM)

    out = pl.pallas_call(
        mlp4_kernel,
        out_shape=jax.ShapeDtypeStruct((B, dout_p), jnp.float32),
        in_specs=[vmem] * 15,
        out_specs=vmem,
        compiler_params=pltpu.CompilerParams(
            vmem_limit_bytes=_vmem_limit_bytes(B, din_p, dh_p, dout_p)),
    )(x,
      pp["w1t"], pp["g1"], pp["be1"],
      pp["w2t"], pp["g2"], pp["be2"],
      pp["w3t"], pp["g3"], pp["be3"],
      pp["w4t"], pp["g4"], pp["be4"],
      pp["w5t"], pp["b5"])

    return out[:, :out_dim]


# --------------------------------------------------------------------------------------
# Deterministic init mimicking PyTorch defaults
# --------------------------------------------------------------------------------------
def make_params(input_dim, hidden_dim, output_dim, key):
    keys = jax.random.split(key, 10)
    params = {}
    dims = [(input_dim, hidden_dim), (hidden_dim, hidden_dim),
            (hidden_dim, hidden_dim), (hidden_dim, hidden_dim),
            (hidden_dim, output_dim)]
    for i, (din, dout) in enumerate(dims, start=1):
        bound = 1.0 / jnp.sqrt(din)
        params[f"w{i}"] = jax.random.uniform(keys[2 * (i - 1)], (dout, din),
                                             jnp.float32, -bound, bound)
        params[f"b{i}"] = jax.random.uniform(keys[2 * (i - 1) + 1], (dout,),
                                             jnp.float32, -bound, bound)
    for i in (1, 2, 3, 4):
        params[f"gamma{i}"] = jnp.ones((hidden_dim,), jnp.float32)
        params[f"beta{i}"] = jnp.zeros((hidden_dim,), jnp.float32)
    return params


# --------------------------------------------------------------------------------------
# Pure-JAX f32 reference with the original module semantics (biases included)
# --------------------------------------------------------------------------------------
def reference_forward(x, params):
    h = x
    for i in (1, 2, 3, 4):
        z = h @ params[f"w{i}"].T + params[f"b{i}"]
        m = z.mean(0, keepdims=True)
        v = ((z - m) ** 2).mean(0, keepdims=True)
        z = (z - m) / jnp.sqrt(v + EPS) * params[f"gamma{i}"] + params[f"beta{i}"]
        h = jnp.maximum(z, 0.0)  # dropout = identity
    logits = h @ params["w5"].T + params["b5"]
    return jax.nn.softmax(logits, axis=-1)


if __name__ == "__main__":
    key = jax.random.PRNGKey(0)
    kx, kp = jax.random.split(key)

    batch, input_dim, hidden_dim, output_dim = 8, 32, 256, 16
    x = jax.random.normal(kx, (batch, input_dim), jnp.float32)
    params = make_params(input_dim, hidden_dim, output_dim, kp)
    pp = prepare_params(params, input_dim, hidden_dim, output_dim)

    out = mlp_4layers_forward(x, pp)
    out = jax.block_until_ready(out)

    ref = reference_forward(x, params)
    assert out.shape == (batch, output_dim)
    # bf16 matmul operands + approx reciprocal -> compare against the f32 reference at a
    # tolerance that covers bf16 rounding (fc biases 1-4 cancel exactly under BN).
    assert jnp.allclose(out, ref, atol=5e-3, rtol=5e-3), "mismatch vs reference"
    # softmax rows must sum to ~1 (approx reciprocal in the denominator)
    assert jnp.allclose(out.sum(-1), 1.0, atol=1e-2)

    print("KERNEL_OK")
</pallas_src>

<mosaic_0001>
module attributes {stable_mosaic.version = 11 : i64} {
  func.func @mlp4_kernel(%arg0: memref<8x128xbf16, #tpu.memory_space<vmem>>, %arg1: memref<128x256xbf16, #tpu.memory_space<vmem>>, %arg2: memref<1x256xf32, #tpu.memory_space<vmem>>, %arg3: memref<1x256xf32, #tpu.memory_space<vmem>>, %arg4: memref<256x256xbf16, #tpu.memory_space<vmem>>, %arg5: memref<1x256xf32, #tpu.memory_space<vmem>>, %arg6: memref<1x256xf32, #tpu.memory_space<vmem>>, %arg7: memref<256x256xbf16, #tpu.memory_space<vmem>>, %arg8: memref<1x256xf32, #tpu.memory_space<vmem>>, %arg9: memref<1x256xf32, #tpu.memory_space<vmem>>, %arg10: memref<256x256xbf16, #tpu.memory_space<vmem>>, %arg11: memref<1x256xf32, #tpu.memory_space<vmem>>, %arg12: memref<1x256xf32, #tpu.memory_space<vmem>>, %arg13: memref<256x128xbf16, #tpu.memory_space<vmem>>, %arg14: memref<1x128xf32, #tpu.memory_space<vmem>>, %arg15: memref<8x128xf32, #tpu.memory_space<vmem>>) attributes {dimension_semantics = [], scalar_prefetch = 0 : i64, scratch_operands = 0 : i64, tpu.core_type = #tpu.core_type<tc>} {
    %c0 = arith.constant 0 : index
    %c0_0 = arith.constant 0 : index
    %0 = vector.load %arg0[%c0, %c0_0] : memref<8x128xbf16, #tpu.memory_space<vmem>>, vector<8x128xbf16>
    %c0_1 = arith.constant 0 : index
    %c0_2 = arith.constant 0 : index
    %1 = vector.load %arg1[%c0_1, %c0_2] : memref<128x256xbf16, #tpu.memory_space<vmem>>, vector<128x256xbf16>
    %cst = arith.constant dense<0.000000e+00> : vector<8x256xf32>
    %2 = tpu.matmul %0, %1, %cst {dimension_numbers = #tpu.dot_dimension_numbers<[1], [0], [0], [1], [0, 0, 1, 1], [], []>} : vector<8x128xbf16>, vector<128x256xbf16>, vector<8x256xf32> -> vector<8x256xf32>
    %cst_3 = arith.constant dense<0.000000e+00> : vector<256xf32>
    %3 = vector.multi_reduction <add>, %2, %cst_3 [0] : vector<8x256xf32> to vector<256xf32>
    %4 = vector.shape_cast %3 : vector<256xf32> to vector<1x256xf32>
    %cst_4 = arith.constant 1.250000e-01 : f32
    %5 = vector.broadcast %cst_4 : f32 to vector<1x256xf32>
    %6 = arith.mulf %4, %5 : vector<1x256xf32>
    %7 = arith.mulf %2, %2 : vector<8x256xf32>
    %cst_5 = arith.constant dense<0.000000e+00> : vector<256xf32>
    %8 = vector.multi_reduction <add>, %7, %cst_5 [0] : vector<8x256xf32> to vector<256xf32>
    %9 = vector.shape_cast %8 : vector<256xf32> to vector<1x256xf32>
    %cst_6 = arith.constant 1.250000e-01 : f32
    %10 = vector.broadcast %cst_6 : f32 to vector<1x256xf32>
    %11 = arith.mulf %9, %10 : vector<1x256xf32>
    %12 = arith.mulf %6, %6 : vector<1x256xf32>
    %13 = arith.subf %11, %12 : vector<1x256xf32>
    %c0_7 = arith.constant 0 : index
    %c0_8 = arith.constant 0 : index
    %14 = vector.load %arg2[%c0_7, %c0_8] : memref<1x256xf32, #tpu.memory_space<vmem>>, vector<1x256xf32>
    %cst_9 = arith.constant 9.99999974E-6 : f32
    %15 = vector.broadcast %cst_9 : f32 to vector<1x256xf32>
    %16 = arith.addf %13, %15 : vector<1x256xf32>
    %17 = math.rsqrt %16 : vector<1x256xf32>
    %18 = arith.mulf %14, %17 : vector<1x256xf32>
    %c0_10 = arith.constant 0 : index
    %c0_11 = arith.constant 0 : index
    %19 = vector.load %arg3[%c0_10, %c0_11] : memref<1x256xf32, #tpu.memory_space<vmem>>, vector<1x256xf32>
    %20 = arith.mulf %6, %18 : vector<1x256xf32>
    %21 = arith.subf %19, %20 : vector<1x256xf32>
    %22 = vector.broadcast %18 : vector<1x256xf32> to vector<8x256xf32>
    %23 = arith.mulf %2, %22 : vector<8x256xf32>
    %24 = vector.broadcast %21 : vector<1x256xf32> to vector<8x256xf32>
    %25 = arith.addf %23, %24 : vector<8x256xf32>
    %cst_12 = arith.constant 0.000000e+00 : f32
    %26 = vector.broadcast %cst_12 : f32 to vector<8x256xf32>
    %27 = arith.maximumf %25, %26 : vector<8x256xf32>
    %28 = arith.truncf %27 : vector<8x256xf32> to vector<8x256xbf16>
    %c0_13 = arith.constant 0 : index
    %c0_14 = arith.constant 0 : index
    %29 = vector.load %arg4[%c0_13, %c0_14] : memref<256x256xbf16, #tpu.memory_space<vmem>>, vector<256x256xbf16>
    %cst_15 = arith.constant dense<0.000000e+00> : vector<8x256xf32>
    %30 = tpu.matmul %28, %29, %cst_15 {dimension_numbers = #tpu.dot_dimension_numbers<[1], [0], [0], [1], [0, 0, 1, 1], [], []>} : vector<8x256xbf16>, vector<256x256xbf16>, vector<8x256xf32> -> vector<8x256xf32>
    %cst_16 = arith.constant dense<0.000000e+00> : vector<256xf32>
    %31 = vector.multi_reduction <add>, %30, %cst_16 [0] : vector<8x256xf32> to vector<256xf32>
    %32 = vector.shape_cast %31 : vector<256xf32> to vector<1x256xf32>
    %cst_17 = arith.constant 1.250000e-01 : f32
    %33 = vector.broadcast %cst_17 : f32 to vector<1x256xf32>
    %34 = arith.mulf %32, %33 : vector<1x256xf32>
    %35 = arith.mulf %30, %30 : vector<8x256xf32>
    %cst_18 = arith.constant dense<0.000000e+00> : vector<256xf32>
    %36 = vector.multi_reduction <add>, %35, %cst_18 [0] : vector<8x256xf32> to vector<256xf32>
    %37 = vector.shape_cast %36 : vector<256xf32> to vector<1x256xf32>
    %cst_19 = arith.constant 1.250000e-01 : f32
    %38 = vector.broadcast %cst_19 : f32 to vector<1x256xf32>
    %39 = arith.mulf %37, %38 : vector<1x256xf32>
    %40 = arith.mulf %34, %34 : vector<1x256xf32>
    %41 = arith.subf %39, %40 : vector<1x256xf32>
    %c0_20 = arith.constant 0 : index
    %c0_21 = arith.constant 0 : index
    %42 = vector.load %arg5[%c0_20, %c0_21] : memref<1x256xf32, #tpu.memory_space<vmem>>, vector<1x256xf32>
    %cst_22 = arith.constant 9.99999974E-6 : f32
    %43 = vector.broadcast %cst_22 : f32 to vector<1x256xf32>
    %44 = arith.addf %41, %43 : vector<1x256xf32>
    %45 = math.rsqrt %44 : vector<1x256xf32>
    %46 = arith.mulf %42, %45 : vector<1x256xf32>
    %c0_23 = arith.constant 0 : index
    %c0_24 = arith.constant 0 : index
    %47 = vector.load %arg6[%c0_23, %c0_24] : memref<1x256xf32, #tpu.memory_space<vmem>>, vector<1x256xf32>
    %48 = arith.mulf %34, %46 : vector<1x256xf32>
    %49 = arith.subf %47, %48 : vector<1x256xf32>
    %50 = vector.broadcast %46 : vector<1x256xf32> to vector<8x256xf32>
    %51 = arith.mulf %30, %50 : vector<8x256xf32>
    %52 = vector.broadcast %49 : vector<1x256xf32> to vector<8x256xf32>
    %53 = arith.addf %51, %52 : vector<8x256xf32>
    %cst_25 = arith.constant 0.000000e+00 : f32
    %54 = vector.broadcast %cst_25 : f32 to vector<8x256xf32>
    %55 = arith.maximumf %53, %54 : vector<8x256xf32>
    %56 = arith.truncf %55 : vector<8x256xf32> to vector<8x256xbf16>
    %c0_26 = arith.constant 0 : index
    %c0_27 = arith.constant 0 : index
    %57 = vector.load %arg7[%c0_26, %c0_27] : memref<256x256xbf16, #tpu.memory_space<vmem>>, vector<256x256xbf16>
    %cst_28 = arith.constant dense<0.000000e+00> : vector<8x256xf32>
    %58 = tpu.matmul %56, %57, %cst_28 {dimension_numbers = #tpu.dot_dimension_numbers<[1], [0], [0], [1], [0, 0, 1, 1], [], []>} : vector<8x256xbf16>, vector<256x256xbf16>, vector<8x256xf32> -> vector<8x256xf32>
    %cst_29 = arith.constant dense<0.000000e+00> : vector<256xf32>
    %59 = vector.multi_reduction <add>, %58, %cst_29 [0] : vector<8x256xf32> to vector<256xf32>
    %60 = vector.shape_cast %59 : vector<256xf32> to vector<1x256xf32>
    %cst_30 = arith.constant 1.250000e-01 : f32
    %61 = vector.broadcast %cst_30 : f32 to vector<1x256xf32>
    %62 = arith.mulf %60, %61 : vector<1x256xf32>
    %63 = arith.mulf %58, %58 : vector<8x256xf32>
    %cst_31 = arith.constant dense<0.000000e+00> : vector<256xf32>
    %64 = vector.multi_reduction <add>, %63, %cst_31 [0] : vector<8x256xf32> to vector<256xf32>
    %65 = vector.shape_cast %64 : vector<256xf32> to vector<1x256xf32>
    %cst_32 = arith.constant 1.250000e-01 : f32
    %66 = vector.broadcast %cst_32 : f32 to vector<1x256xf32>
    %67 = arith.mulf %65, %66 : vector<1x256xf32>
    %68 = arith.mulf %62, %62 : vector<1x256xf32>
    %69 = arith.subf %67, %68 : vector<1x256xf32>
    %c0_33 = arith.constant 0 : index
    %c0_34 = arith.constant 0 : index
    %70 = vector.load %arg8[%c0_33, %c0_34] : memref<1x256xf32, #tpu.memory_space<vmem>>, vector<1x256xf32>
    %cst_35 = arith.constant 9.99999974E-6 : f32
    %71 = vector.broadcast %cst_35 : f32 to vector<1x256xf32>
    %72 = arith.addf %69, %71 : vector<1x256xf32>
    %73 = math.rsqrt %72 : vector<1x256xf32>
    %74 = arith.mulf %70, %73 : vector<1x256xf32>
    %c0_36 = arith.constant 0 : index
    %c0_37 = arith.constant 0 : index
    %75 = vector.load %arg9[%c0_36, %c0_37] : memref<1x256xf32, #tpu.memory_space<vmem>>, vector<1x256xf32>
    %76 = arith.mulf %62, %74 : vector<1x256xf32>
    %77 = arith.subf %75, %76 : vector<1x256xf32>
    %78 = vector.broadcast %74 : vector<1x256xf32> to vector<8x256xf32>
    %79 = arith.mulf %58, %78 : vector<8x256xf32>
    %80 = vector.broadcast %77 : vector<1x256xf32> to vector<8x256xf32>
    %81 = arith.addf %79, %80 : vector<8x256xf32>
    %cst_38 = arith.constant 0.000000e+00 : f32
    %82 = vector.broadcast %cst_38 : f32 to vector<8x256xf32>
    %83 = arith.maximumf %81, %82 : vector<8x256xf32>
    %84 = arith.truncf %83 : vector<8x256xf32> to vector<8x256xbf16>
    %c0_39 = arith.constant 0 : index
    %c0_40 = arith.constant 0 : index
    %85 = vector.load %arg10[%c0_39, %c0_40] : memref<256x256xbf16, #tpu.memory_space<vmem>>, vector<256x256xbf16>
    %cst_41 = arith.constant dense<0.000000e+00> : vector<8x256xf32>
    %86 = tpu.matmul %84, %85, %cst_41 {dimension_numbers = #tpu.dot_dimension_numbers<[1], [0], [0], [1], [0, 0, 1, 1], [], []>} : vector<8x256xbf16>, vector<256x256xbf16>, vector<8x256xf32> -> vector<8x256xf32>
    %cst_42 = arith.constant dense<0.000000e+00> : vector<256xf32>
    %87 = vector.multi_reduction <add>, %86, %cst_42 [0] : vector<8x256xf32> to vector<256xf32>
    %88 = vector.shape_cast %87 : vector<256xf32> to vector<1x256xf32>
    %cst_43 = arith.constant 1.250000e-01 : f32
    %89 = vector.broadcast %cst_43 : f32 to vector<1x256xf32>
    %90 = arith.mulf %88, %89 : vector<1x256xf32>
    %91 = arith.mulf %86, %86 : vector<8x256xf32>
    %cst_44 = arith.constant dense<0.000000e+00> : vector<256xf32>
    %92 = vector.multi_reduction <add>, %91, %cst_44 [0] : vector<8x256xf32> to vector<256xf32>
    %93 = vector.shape_cast %92 : vector<256xf32> to vector<1x256xf32>
    %cst_45 = arith.constant 1.250000e-01 : f32
    %94 = vector.broadcast %cst_45 : f32 to vector<1x256xf32>
    %95 = arith.mulf %93, %94 : vector<1x256xf32>
    %96 = arith.mulf %90, %90 : vector<1x256xf32>
    %97 = arith.subf %95, %96 : vector<1x256xf32>
    %c0_46 = arith.constant 0 : index
    %c0_47 = arith.constant 0 : index
    %98 = vector.load %arg11[%c0_46, %c0_47] : memref<1x256xf32, #tpu.memory_space<vmem>>, vector<1x256xf32>
    %cst_48 = arith.constant 9.99999974E-6 : f32
    %99 = vector.broadcast %cst_48 : f32 to vector<1x256xf32>
    %100 = arith.addf %97, %99 : vector<1x256xf32>
    %101 = math.rsqrt %100 : vector<1x256xf32>
    %102 = arith.mulf %98, %101 : vector<1x256xf32>
    %c0_49 = arith.constant 0 : index
    %c0_50 = arith.constant 0 : index
    %103 = vector.load %arg12[%c0_49, %c0_50] : memref<1x256xf32, #tpu.memory_space<vmem>>, vector<1x256xf32>
    %104 = arith.mulf %90, %102 : vector<1x256xf32>
    %105 = arith.subf %103, %104 : vector<1x256xf32>
    %106 = vector.broadcast %102 : vector<1x256xf32> to vector<8x256xf32>
    %107 = arith.mulf %86, %106 : vector<8x256xf32>
    %108 = vector.broadcast %105 : vector<1x256xf32> to vector<8x256xf32>
    %109 = arith.addf %107, %108 : vector<8x256xf32>
    %cst_51 = arith.constant 0.000000e+00 : f32
    %110 = vector.broadcast %cst_51 : f32 to vector<8x256xf32>
    %111 = arith.maximumf %109, %110 : vector<8x256xf32>
    %112 = arith.truncf %111 : vector<8x256xf32> to vector<8x256xbf16>
    %c0_52 = arith.constant 0 : index
    %c0_53 = arith.constant 0 : index
    %113 = vector.load %arg13[%c0_52, %c0_53] : memref<256x128xbf16, #tpu.memory_space<vmem>>, vector<256x128xbf16>
    %cst_54 = arith.constant dense<0.000000e+00> : vector<8x128xf32>
    %114 = tpu.matmul %112, %113, %cst_54 {dimension_numbers = #tpu.dot_dimension_numbers<[1], [0], [0], [1], [0, 0, 1, 1], [], []>} : vector<8x256xbf16>, vector<256x128xbf16>, vector<8x128xf32> -> vector<8x128xf32>
    %c0_55 = arith.constant 0 : index
    %c0_56 = arith.constant 0 : index
    %115 = vector.load %arg14[%c0_55, %c0_56] : memref<1x128xf32, #tpu.memory_space<vmem>>, vector<1x128xf32>
    %116 = vector.broadcast %115 : vector<1x128xf32> to vector<8x128xf32>
    %117 = arith.addf %114, %116 : vector<8x128xf32>
    %cst_57 = arith.constant dense<0xFF800000> : vector<8xf32>
    %118 = vector.multi_reduction <maximumf>, %117, %cst_57 [1] : vector<8x128xf32> to vector<8xf32>
    %119 = vector.shape_cast %118 : vector<8xf32> to vector<8x1xf32>
    %120 = vector.broadcast %119 : vector<8x1xf32> to vector<8x128xf32>
    %121 = arith.subf %117, %120 : vector<8x128xf32>
    %122 = math.exp %121 : vector<8x128xf32>
    %cst_58 = arith.constant dense<0.000000e+00> : vector<8xf32>
    %123 = vector.multi_reduction <add>, %122, %cst_58 [1] : vector<8x128xf32> to vector<8xf32>
    %124 = vector.shape_cast %123 : vector<8xf32> to vector<8x1xf32>
    %125 = tpu.reciprocal %124 {approx = true} : vector<8x1xf32> -> vector<8x1xf32>
    %126 = vector.broadcast %125 : vector<8x1xf32> to vector<8x128xf32>
    %127 = arith.mulf %122, %126 : vector<8x128xf32>
    %c0_59 = arith.constant 0 : index
    %c0_60 = arith.constant 0 : index
    %128 = vector.load %arg15[%c0_59, %c0_60] : memref<8x128xf32, #tpu.memory_space<vmem>>, vector<8x128xf32>
    tpu.vector_store %arg15[%c0_59, %c0_60], %127 {strides = array<i32>} : memref<8x128xf32, #tpu.memory_space<vmem>>, vector<8x128xf32>,
    return
  }
}

</mosaic_0001>

<bundles_post_ra>
// kernel: tpu_custom_call.1
= control target key start
LH: loop header
LB: loop body
LE: loop exit
PB: predicated region body
PF: predicated region fallthrough
CT: control target
= control target key end

     0   :  { %s2398_s0 = inlined_call_operand.hbm [shape: bf16[8,128], index: 0, kind: input, shape index: {}]   ;;  %s2399_s1 = inlined_call_operand.hbm [shape: bf16[128,256], index: 1, kind: input, shape index: {}]   ;;  %s2400_s2 = inlined_call_operand.vmem [shape: f32[1,256], index: 2, kind: input, shape index: {}]   ;;  %s2401_s3 = inlined_call_operand.vmem [shape: f32[1,256], index: 3, kind: input, shape index: {}]   ;;  %s2402_s4 = inlined_call_operand.hbm [shape: bf16[256,256], index: 4, kind: input, shape index: {}]   ;;  %s2403_s5 = inlined_call_operand.vmem [shape: f32[1,256], index: 5, kind: input, shape index: {}]   ;;  %s2404_s6 = inlined_call_operand.vmem [shape: f32[1,256], index: 6, kind: input, shape index: {}]   ;;  %s2405_s7 = inlined_call_operand.hbm [shape: bf16[256,256], index: 7, kind: input, shape index: {}]   ;;  %s2406_s8 = inlined_call_operand.vmem [shape: f32[1,256], index: 8, kind: input, shape index: {}]   ;;  %s2407_s9 = inlined_call_operand.vmem [shape: f32[1,256], index: 9, kind: input, shape index: {}]   ;;  %s2408_s10 = inlined_call_operand.hbm [shape: bf16[256,256], index: 10, kind: input, shape index: {}]   ;;  %s2409_s11 = inlined_call_operand.vmem [shape: f32[1,256], index: 11, kind: input, shape index: {}]   ;;  %s2410_s12 = inlined_call_operand.vmem [shape: f32[1,256], index: 12, kind: input, shape index: {}]   ;;  %s2411_s13 = inlined_call_operand.hbm [shape: bf16[256,128], index: 13, kind: input, shape index: {}]   ;;  %s2412_s14 = inlined_call_operand.vmem [shape: f32[1,128], index: 14, kind: input, shape index: {}]   ;;  %s2413_s15 = inlined_call_operand.hbm [shape: f32[8,128], index: 15, kind: output, shape index: {}]  }
   0x1   :  { %2415 = sst [smem:[#allocation19_spill]] %s2413_s15 }
   0x2   :  { %20 = vsyncpa [#allocation3], 0 }
   0x3   :  { %21 = vsyncpa [#allocation6], 0 }
   0x4   :  { %22 = vsyncpa [#allocation9], 0 }
   0x5   :  { %23 = vsyncpa [#allocation12], 0 }
   0x6   :  { %24 = vsyncpa [#allocation4], 0  ;;  %s2144_s18 = smov [#allocation5]   ;;  %s1980_s22 = scalar_lea.hbm %s2399_s1, 2048 }
   0x7   :  { %s40_s19 = sshll.u32 %s2144_s18, 4  ;;  %p1981_p0 = scmp.ne.s32.totalorder %s2399_s1, %s1980_s22  ;;  %s41_s19 = int_to_ptr.vmem [resolvable:$true] %s40_s19 }
   0x8   :  { %p1984_p1 = scmp.lt.u32.totalorder %s1980_s22, %s2399_s1 }
   0xa   :  { %p1986_p2 = pnand %p1984_p1, %p1981_p0 }
   0xc   :  { %1989 = shalt.err (!%p1986_p2)
}
   0xd   :  { %s1990_s27 = scalar_lea.vmem %s41_s19, 2048  ;;  %p1995_p4 = scmp.lt.s32.totalorder %s41_s19, %s41_s19 }
   0xe   :  { %p1991_p3 = scmp.ne.s32.totalorder %s41_s19, %s1990_s27  ;;  %p1996_p5 = scmp.lt.s32.totalorder %s1990_s27, %s1990_s27 }
  0x10   :  { %p1997_p6 = por %p1996_p5, %p1995_p4 }
  0x12   :  { %p1998_p7 = pnand %p1997_p6, %p1991_p3 }
  0x14   :  { %2001 = shalt.err (!%p1998_p7)
}
  0x15   :  { %s2145_s28 = smov 128   ;;  %s2146_s29 = smov 8  }
  0x16   :  { %46 = dma.hbm_to_vmem [thread:$0]  %s2399_s1, 2048, %s41_s19, [#allocation6], %s2145_s28, %s2145_s28, %s2146_s29  }
  0x17   :  { %s2147_s17 = smov [#allocation8]   ;;  %s2148_s20 = smov [#allocation2]  }
  0x18   :  { %s72_s18 = sshll.u32 %s2147_s17, 4  ;;  %s31_s21 = sshll.u32 %s2148_s20, 4  ;;  %s73_s18 = int_to_ptr.vmem [resolvable:$true] %s72_s18  ;;  %s32_s21 = int_to_ptr.vmem [resolvable:$true] %s31_s21 }
  0x19   :  { %s2002_s24 = scalar_lea.hbm %s2405_s7, 4096 }
  0x1a   :  { %p2003_p8 = scmp.ne.s32.totalorder %s2405_s7, %s2002_s24  ;;  %p2006_p9 = scmp.lt.u32.totalorder %s2002_s24, %s2405_s7 }
  0x1c   :  { %p2008_p10 = pnand %p2006_p9, %p2003_p8 }
  0x1e   :  { %2011 = shalt.err (!%p2008_p10)
}
  0x1f   :  { %s2012_s1 = scalar_lea.vmem %s73_s18, 4096  ;;  %p2017_p12 = scmp.lt.s32.totalorder %s73_s18, %s73_s18 }
  0x20   :  { %p2013_p11 = scmp.ne.s32.totalorder %s73_s18, %s2012_s1  ;;  %p2018_p13 = scmp.lt.s32.totalorder %s2012_s1, %s2012_s1 }
  0x22   :  { %p2019_p0 = por %p2018_p13, %p2017_p12 }
  0x24   :  { %p2020_p1 = pnand %p2019_p0, %p2013_p11 }
  0x26   :  { %2023 = shalt.err (!%p2020_p1)
}
  0x27   :  { %78 = dma.hbm_to_vmem [thread:$0]  %s2405_s7, 4096, %s73_s18, [#allocation9], %s2145_s28, %s2145_s28, %s2146_s29  }
  0x28   :  { %s2024_s17 = scalar_lea.hbm %s2398_s0, 64 }
  0x29   :  { %p2025_p2 = scmp.ne.s32.totalorder %s2398_s0, %s2024_s17  ;;  %p2028_p3 = scmp.lt.u32.totalorder %s2024_s17, %s2398_s0 }
  0x2b   :  { %p2030_p4 = pnand %p2028_p3, %p2025_p2 }
  0x2d   :  { %2033 = shalt.err (!%p2030_p4)
}
  0x2e   :  { %s2034_s25 = scalar_lea.vmem %s32_s21, 64  ;;  %p2039_p6 = scmp.lt.s32.totalorder %s32_s21, %s32_s21 }
  0x2f   :  { %p2035_p5 = scmp.ne.s32.totalorder %s32_s21, %s2034_s25  ;;  %p2040_p7 = scmp.lt.s32.totalorder %s2034_s25, %s2034_s25 }
  0x31   :  { %p2041_p8 = por %p2040_p7, %p2039_p6 }
  0x33   :  { %p2042_p9 = pnand %p2041_p8, %p2035_p5 }
  0x35   :  { %2045 = shalt.err (!%p2042_p9)
}
  0x36   :  { %34 = dma.hbm_to_vmem [thread:$0]  %s2398_s0, 64, %s32_s21, [#allocation3]  }
  0x37   :  { %s2149_s26 = smov [#allocation7]   ;;  %s2150_s1 = smov [#allocation10]  }
  0x38   :  { %s56_s27 = sshll.u32 %s2149_s26, 4  ;;  %s88_s19 = sshll.u32 %s2150_s1, 4  ;;  %s57_s27 = int_to_ptr.vmem [resolvable:$true] %s56_s27  ;;  %s89_s19 = int_to_ptr.vmem [resolvable:$true] %s88_s19 }
  0x39   :  { %s2046_s15 = scalar_lea.hbm %s2402_s4, 4096 }
  0x3a   :  { %p2047_p10 = scmp.ne.s32.totalorder %s2402_s4, %s2046_s15  ;;  %p2050_p11 = scmp.lt.u32.totalorder %s2046_s15, %s2402_s4 }
  0x3c   :  { %p2052_p12 = pnand %p2050_p11, %p2047_p10 }
  0x3e   :  { %2055 = shalt.err (!%p2052_p12)
}
  0x3f   :  { %s2056_s0 = scalar_lea.vmem %s57_s27, 4096  ;;  %p2061_p0 = scmp.lt.s32.totalorder %s57_s27, %s57_s27 }
  0x40   :  { %p2057_p13 = scmp.ne.s32.totalorder %s57_s27, %s2056_s0  ;;  %p2062_p1 = scmp.lt.s32.totalorder %s2056_s0, %s2056_s0 }
  0x42   :  { %p2063_p2 = por %p2062_p1, %p2061_p0 }
  0x44   :  { %p2064_p3 = pnand %p2063_p2, %p2057_p13 }
  0x46   :  { %2067 = shalt.err (!%p2064_p3)
}
  0x47   :  { %62 = dma.hbm_to_vmem [thread:$0]  %s2402_s4, 4096, %s57_s27, [#allocation6], %s2145_s28, %s2145_s28, %s2146_s29  }
  0x48   :  { %s2068_s18 = scalar_lea.hbm %s2408_s10, 4096 }
  0x49   :  { %p2069_p4 = scmp.ne.s32.totalorder %s2408_s10, %s2068_s18  ;;  %p2072_p5 = scmp.lt.u32.totalorder %s2068_s18, %s2408_s10 }
  0x4b   :  { %p2074_p6 = pnand %p2072_p5, %p2069_p4 }
  0x4d   :  { %2077 = shalt.err (!%p2074_p6)
}
  0x4e   :  { %s2078_s15 = scalar_lea.vmem %s89_s19, 4096  ;;  %p2083_p8 = scmp.lt.s32.totalorder %s89_s19, %s89_s19 }
  0x4f   :  { %p2079_p7 = scmp.ne.s32.totalorder %s89_s19, %s2078_s15  ;;  %p2084_p9 = scmp.lt.s32.totalorder %s2078_s15, %s2078_s15 }
  0x51   :  { %p2085_p10 = por %p2084_p9, %p2083_p8 }
  0x53   :  { %p2086_p11 = pnand %p2085_p10, %p2079_p7 }
  0x55   :  { %2089 = shalt.err (!%p2086_p11)
}
  0x56   :  { %94 = dma.hbm_to_vmem [thread:$0]  %s2408_s10, 4096, %s89_s19, [#allocation9], %s2145_s28, %s2145_s28, %s2146_s29  }
  0x57   :  { %s2151_s17 = smov [#allocation11]   ;;  %s2090_s0 = scalar_lea.hbm %s2411_s13, 2048 }
  0x58   :  { %s104_s20 = sshll.u32 %s2151_s17, 4  ;;  %p2091_p12 = scmp.ne.s32.totalorder %s2411_s13, %s2090_s0  ;;  %s105_s20 = int_to_ptr.vmem [resolvable:$true] %s104_s20 }
  0x59   :  { %p2094_p13 = scmp.lt.u32.totalorder %s2090_s0, %s2411_s13 }
  0x5b   :  { %p2096_p0 = pnand %p2094_p13, %p2091_p12 }
  0x5d   :  { %2099 = shalt.err (!%p2096_p0)
}
  0x5e   :  { %s2100_s18 = scalar_lea.vmem %s105_s20, 2048  ;;  %p2105_p2 = scmp.lt.s32.totalorder %s105_s20, %s105_s20 }
  0x5f   :  { %p2101_p1 = scmp.ne.s32.totalorder %s105_s20, %s2100_s18  ;;  %p2106_p3 = scmp.lt.s32.totalorder %s2100_s18, %s2100_s18 }
  0x61   :  { %p2107_p4 = por %p2106_p3, %p2105_p2 }
  0x63   :  { %p2108_p5 = pnand %p2107_p4, %p2101_p1 }
  0x65   :  { %2111 = shalt.err (!%p2108_p5)
}
  0x66   :  { %s2152_s10 = smov 64   ;;  %s2153_s28 = smov 4  }
  0x67   :  { %110 = dma.hbm_to_vmem [thread:$0]  %s2411_s13, 2048, %s105_s20, [#allocation12], %s2152_s10, %s2152_s10, %s2153_s28  }
  0x68   :  { %2134 = dma.done.wait [#allocation3], 64  }
  0x69   :  { %2135 = vsyncadd [#allocation3], 4294967232 }
  0x6a   :  { %2136 = dma.done.wait [#allocation6], 6144  }
  0x6b   :  { %2137 = vsyncadd [#allocation6], 4294961152 }
  0x6c   :  { %2138 = dma.done.wait [#allocation9], 8192  }
  0x6d   :  { %2139 = vsyncadd [#allocation9], 4294959104 }
  0x6e   :  { %2140 = dma.done.wait [#allocation12], 2048  }
  0x6f   :  { %2141 = vsyncadd [#allocation12], 4294965248  ;;  %v2154_v0 = vmov 0   ;;  %v1776_v1 = vld [vmem:[#allocation5 + $0x4] ss:$8 sps:$4 sm:$0xff]  }
  0x70   :  { %261 = vmatprep.mubr.bf16.mxu0 %v2154_v0  ;;  %v1778_v2 = vld [vmem:[#allocation5] ss:$8 sps:$4 sm:$0xff]   ;;  %229 = vmatprep.subr.bf16.mxu0 %v1776_v1  ;;  %v1779_v3 = vld [vmem:[#allocation5 + $0x14] ss:$8 sps:$4 sm:$0xff]   ;;  %v1781_v4 = vld [vmem:[#allocation5 + $0x10] ss:$8 sps:$4 sm:$0xff]  }
  0x71   :  { %230 = vmatpush1.bf16.msra.mxu0 %v1778_v2  ;;  %v1782_v5 = vld [vmem:[#allocation5 + $0x24] ss:$8 sps:$4 sm:$0xff]   ;;  %v1784_v6 = vld [vmem:[#allocation5 + $0x20] ss:$8 sps:$4 sm:$0xff]   ;;  %v1785_v7 = vld [vmem:[#allocation5 + $0x34] ss:$8 sps:$4 sm:$0xff]  }
  0x72   :  { %231 = vmatprep.subr.bf16.mxu0 %v1779_v3  ;;  %v1787_v8 = vld [vmem:[#allocation5 + $0x30] ss:$8 sps:$4 sm:$0xff]   ;;  %v1788_v9 = vld [vmem:[#allocation5 + $0x44] ss:$8 sps:$4 sm:$0xff]   ;;  %v1802_v11 = vld [vmem:[#allocation7] ss:$8 sps:$4 sm:$0xff]  }
  0x73   :  { %v1800_v10 = vld [vmem:[#allocation7 + $0x4] ss:$8 sps:$4 sm:$0xff]   ;;  %v1790_v12 = vld [vmem:[#allocation5 + $0x40] ss:$8 sps:$4 sm:$0xff]   ;;  %v1791_v13 = vld [vmem:[#allocation5 + $0x54] ss:$8 sps:$4 sm:$0xff]  }
  0x74   :  { %572 = vmatprep.subr.bf16.mxu1 %v1800_v10  ;;  %v1793_v14 = vld [vmem:[#allocation5 + $0x50] ss:$8 sps:$4 sm:$0xff]   ;;  %v1794_v15 = vld [vmem:[#allocation5 + $0x64] ss:$8 sps:$4 sm:$0xff]   ;;  %v1796_v16 = vld [vmem:[#allocation5 + $0x60] ss:$8 sps:$4 sm:$0xff]  }
  0x75   :  { %232 = vmatpush1.bf16.msra.mxu0 %v1781_v4  ;;  %573 = vmatpush1.bf16.msra.mxu1 %v1802_v11  ;;  %v1797_v17 = vld [vmem:[#allocation5 + $0x74] ss:$8 sps:$4 sm:$0xff]   ;;  %v1799_v18 = vld [vmem:[#allocation5 + $0x70] ss:$8 sps:$4 sm:$0xff]   ;;  %v1806_v22 = vld [vmem:[#allocation7 + $0x24] ss:$8 sps:$4 sm:$0xff]  }
  0x76   :  { %233 = vmatprep.subr.bf16.mxu0 %v1782_v5  ;;  %v132_v19 = vld [vmem:[#allocation2] sm:$0xf]  ;;  %v1805_v21 = vld [vmem:[#allocation7 + $0x10] ss:$8 sps:$4 sm:$0xff]   ;;  %v1808_v23 = vld [vmem:[#allocation7 + $0x20] ss:$8 sps:$4 sm:$0xff]  }
  0x77   :  { %v1803_v20 = vld [vmem:[#allocation7 + $0x14] ss:$8 sps:$4 sm:$0xff]   ;;  %v1811_v25 = vld [vmem:[#allocation7 + $0x30] ss:$8 sps:$4 sm:$0xff]   ;;  %v1812_v26 = vld [vmem:[#allocation7 + $0x44] ss:$8 sps:$4 sm:$0xff]  }
  0x78   :  { %574 = vmatprep.subr.bf16.mxu1 %v1803_v20  ;;  %v1809_v24 = vld [vmem:[#allocation7 + $0x34] ss:$8 sps:$4 sm:$0xff]   ;;  %v1814_v27 = vld [vmem:[#allocation7 + $0x40] ss:$8 sps:$4 sm:$0xff]   ;;  %v1817_v29 = vld [vmem:[#allocation7 + $0x50] ss:$8 sps:$4 sm:$0xff]  }
  0x79   :  { %234 = vmatpush1.bf16.msra.mxu0 %v1784_v6  ;;  %575 = vmatpush1.bf16.msra.mxu1 %v1805_v21  ;;  %v1815_v28 = vld [vmem:[#allocation7 + $0x54] ss:$8 sps:$4 sm:$0xff]   ;;  %v1818_v30 = vld [vmem:[#allocation7 + $0x64] ss:$8 sps:$4 sm:$0xff]   ;;  %v1820_v31 = vld [vmem:[#allocation7 + $0x60] ss:$8 sps:$4 sm:$0xff]  }
  0x7a   :  { %235 = vmatprep.subr.bf16.mxu0 %v1785_v7  ;;  %576 = vmatprep.subr.bf16.mxu1 %v1806_v22  ;;  %v1821_v32 = vld [vmem:[#allocation7 + $0x74] ss:$8 sps:$4 sm:$0xff]   ;;  %v1823_v33 = vld [vmem:[#allocation7 + $0x70] ss:$8 sps:$4 sm:$0xff]   ;;  %v1824_v34 = vld [vmem:[#allocation7 + $0x84] ss:$8 sps:$4 sm:$0xff]  }
  0x7b   :  { %v1826_v35 = vld [vmem:[#allocation7 + $0x80] ss:$8 sps:$4 sm:$0xff]   ;;  %v1827_v36 = vld [vmem:[#allocation7 + $0x94] ss:$8 sps:$4 sm:$0xff]   ;;  %v1829_v37 = vld [vmem:[#allocation7 + $0x90] ss:$8 sps:$4 sm:$0xff]  }
  0x7c   :  { %v1830_v38 = vld [vmem:[#allocation7 + $0xa4] ss:$8 sps:$4 sm:$0xff]   ;;  %v1832_v39 = vld [vmem:[#allocation7 + $0xa0] ss:$8 sps:$4 sm:$0xff]   ;;  %v1833_v40 = vld [vmem:[#allocation7 + $0xb4] ss:$8 sps:$4 sm:$0xff]  }
  0x7d   :  { %236 = vmatpush1.bf16.msra.mxu0 %v1787_v8  ;;  %577 = vmatpush1.bf16.msra.mxu1 %v1808_v23  ;;  %v1835_v41 = vld [vmem:[#allocation7 + $0xb0] ss:$8 sps:$4 sm:$0xff]   ;;  %v1836_v42 = vld [vmem:[#allocation7 + $0xc4] ss:$8 sps:$4 sm:$0xff]   ;;  %v1838_v43 = vld [vmem:[#allocation7 + $0xc0] ss:$8 sps:$4 sm:$0xff]  }
  0x7e   :  { %237 = vmatprep.subr.bf16.mxu0 %v1788_v9  ;;  %578 = vmatprep.subr.bf16.mxu1 %v1809_v24  ;;  %v1839_v44 = vld [vmem:[#allocation7 + $0xd4] ss:$8 sps:$4 sm:$0xff]   ;;  %v1841_v45 = vld [vmem:[#allocation7 + $0xd0] ss:$8 sps:$4 sm:$0xff]   ;;  %v1842_v46 = vld [vmem:[#allocation7 + $0xe4] ss:$8 sps:$4 sm:$0xff]  }
  0x7f   :  { %v1844_v47 = vld [vmem:[#allocation7 + $0xe0] ss:$8 sps:$4 sm:$0xff]   ;;  %v1845_v48 = vld [vmem:[#allocation7 + $0xf4] ss:$8 sps:$4 sm:$0xff]   ;;  %v1847_v49 = vld [vmem:[#allocation7 + $0xf0] ss:$8 sps:$4 sm:$0xff]  }
  0x80   :  { %v1848_v50 = vld [vmem:[#allocation8] ss:$8 sps:$4 sm:$0xff]   ;;  %v1850_v51 = vld [vmem:[#allocation8 + $0x4] ss:$8 sps:$4 sm:$0xff]  }
  0x81   :  { %238 = vmatpush1.bf16.msra.mxu0 %v1790_v12  ;;  %579 = vmatpush1.bf16.msra.mxu1 %v1811_v25 }
  0x82   :  { %239 = vmatprep.subr.bf16.mxu0 %v1791_v13  ;;  %580 = vmatprep.subr.bf16.mxu1 %v1812_v26 }
  0x85   :  { %240 = vmatpush1.bf16.msra.mxu0 %v1793_v14  ;;  %581 = vmatpush1.bf16.msra.mxu1 %v1814_v27 }
  0x86   :  { %241 = vmatprep.subr.bf16.mxu0 %v1794_v15  ;;  %582 = vmatprep.subr.bf16.mxu1 %v1815_v28  ;;  %v2155_v28 = vmov 1966171168  }
  0x89   :  { %242 = vmatpush1.bf16.msra.mxu0 %v1796_v16  ;;  %583 = vmatpush1.bf16.msra.mxu1 %v1817_v29  ;;  %v313_v29 = vunpack.c.l.s4 %v2155_v28  ;;  %v1896_v28 = vld [vmem:[#allocation10] ss:$8 sps:$4 sm:$0xff]  }
  0x8a   :  { %243 = vmatprep.subr.bf16.mxu0 %v1797_v17  ;;  %584 = vmatprep.subr.bf16.mxu1 %v1818_v30  ;;  %v315_v30 = vlaneseq }
  0x8d   :  { %244 = vmatpush1.bf16.msra.mxu0 %v1799_v18  ;;  %585 = vmatpush1.bf16.msra.mxu1 %v1820_v31  ;;  %v314_v31 = vunpack.c.0.s8 %v313_v29  ;;  %v1898_v29 = vld [vmem:[#allocation10 + $0x4] ss:$8 sps:$4 sm:$0xff]  }
  0x8e   :  { %586 = vmatprep.subr.bf16.mxu1 %v1821_v32  ;;  %915 = vmatprep.subr.bf16.mxu0 %v1850_v51  ;;  %v316_v32 = vshrl.u32 %v315_v30, 7  ;;  %v328_v51 = vld [vmem:[%s2401_s3] sm:$0x3] }
  0x90   :  { %262 = vmatmul.mubr.bf16.vlgmr.msra.gmra.mrb[0].mxu0 %v132_v19 }
  0x91   :  { %587 = vmatpush1.bf16.msra.mxu1 %v1823_v33  ;;  %916 = vmatpush1.bf16.msra.mxu0 %v1848_v50 }
  0x92   :  { %588 = vmatprep.subr.bf16.mxu1 %v1824_v34  ;;  %v2321_v34 = vsub.s32 %v314_v31, %v316_v32 }
  0x95   :  { %589 = vmatpush1.bf16.msra.mxu1 %v1826_v35 }
  0x96   :  { %590 = vmatprep.subr.bf16.mxu1 %v1827_v36 }
  0x99   :  { %591 = vmatpush1.bf16.msra.mxu1 %v1829_v37 }
  0x9a   :  { %592 = vmatprep.subr.bf16.mxu1 %v1830_v38  ;;  %v304_v38 = vld [vmem:[%s2400_s2] sm:$0x3] }
  0x9d   :  { %593 = vmatpush1.bf16.msra.mxu1 %v1832_v39 }
  0x9e   :  { %594 = vmatprep.subr.bf16.mxu1 %v1833_v40  ;;  %v2328_v40 = vsub.s32 0, %v316_v32 }
  0xa1   :  { %595 = vmatpush1.bf16.msra.mxu1 %v1835_v41  ;;  %v2330_v41 = vsub.s32 1, %v316_v32 }
  0xa2   :  { %596 = vmatprep.subr.bf16.mxu1 %v1836_v42 }
  0xa5   :  { %597 = vmatpush1.bf16.msra.mxu1 %v1838_v43 }
  0xa6   :  { %598 = vmatprep.subr.bf16.mxu1 %v1839_v44 }
  0xa9   :  { %599 = vmatpush1.bf16.msra.mxu1 %v1841_v45 }
  0xaa   :  { %600 = vmatprep.subr.bf16.mxu1 %v1842_v46 }
  0xad   :  { %601 = vmatpush1.bf16.msra.mxu1 %v1844_v47 }
  0xae   :  { %602 = vmatprep.subr.bf16.mxu1 %v1845_v48 }
  0xb1   :  { %603 = vmatpush1.bf16.msra.mxu1 %v1847_v49 }
  0xb2   :  { %1258 = vmatprep.subr.bf16.mxu1 %v1898_v29 }
 0x163   :  { %v263_v52 = vpop.f32.mrb[0].mxu0 }
 0x164   :  { %v270_v53 = vrot.slane %v263_v52, 4  ;;  %v284_v54 = vmul.f32 %v263_v52, %v263_v52  ;;  %v265_v55 = vpop.f32.mrb[1].mxu0 }
 0x165   :  { %v276_v56 = vrot.slane %v265_v55, 4  ;;  %v285_v57 = vmul.f32 %v265_v55, %v265_v55  ;;  %v267_v58 = vpop.f32.mrb[2].mxu0 }
 0x166   :  { %v271_v59 = vadd.f32 %v270_v53, %v263_v52  ;;  %v286_v60 = vrot.slane %v284_v54, 4  ;;  %v268_v61 = vpop.f32.mrb[3].mxu0 }
 0x167   :  { %v277_v62 = vadd.f32 %v276_v56, %v265_v55  ;;  %v292_v63 = vrot.slane %v285_v57, 4 }
 0x168   :  { %v272_v0 = vrot.slane %v271_v59, 2  ;;  %v287_v1 = vadd.f32 %v286_v60, %v284_v54 }
 0x169   :  { %v278_v2 = vrot.slane %v277_v62, 2  ;;  %v293_v3 = vadd.f32 %v292_v63, %v285_v57  ;;  %v1851_v63 = vld [vmem:[#allocation8 + $0x10] ss:$8 sps:$4 sm:$0xff]  }
 0x16a   :  { %v273_v4 = vadd.f32 %v272_v0, %v271_v59  ;;  %v288_v5 = vrot.slane %v287_v1, 2  ;;  %v1856_v0 = vld [vmem:[#allocation8 + $0x24] ss:$8 sps:$4 sm:$0xff]  }
 0x16b   :  { %v279_v6 = vadd.f32 %v278_v2, %v277_v62  ;;  %v294_v7 = vrot.slane %v293_v3, 2  ;;  %v1853_v62 = vld [vmem:[#allocation8 + $0x14] ss:$8 sps:$4 sm:$0xff]  }
 0x16c   :  { %v274_v8 = vrot.slane %v273_v4, 1  ;;  %v289_v9 = vadd.f32 %v288_v5, %v287_v1  ;;  %917 = vmatprep.subr.bf16.mxu0 %v1853_v62  ;;  %v1854_v1 = vld [vmem:[#allocation8 + $0x20] ss:$8 sps:$4 sm:$0xff]   ;;  %v1859_v2 = vld [vmem:[#allocation8 + $0x34] ss:$8 sps:$4 sm:$0xff]  }
 0x16d   :  { %v280_v10 = vrot.slane %v279_v6, 1  ;;  %v295_v11 = vadd.f32 %v294_v7, %v293_v3  ;;  %918 = vmatpush1.bf16.msra.mxu0 %v1851_v63  ;;  %v1857_v3 = vld [vmem:[#allocation8 + $0x30] ss:$8 sps:$4 sm:$0xff]   ;;  %v1860_v5 = vld [vmem:[#allocation8 + $0x40] ss:$8 sps:$4 sm:$0xff]  }
 0x16e   :  { %v275_v12 = vadd.f32 %v274_v8, %v273_v4  ;;  %v290_v13 = vrot.slane %v289_v9, 1  ;;  %919 = vmatprep.subr.bf16.mxu0 %v1856_v0  ;;  %v1862_v4 = vld [vmem:[#allocation8 + $0x44] ss:$8 sps:$4 sm:$0xff]   ;;  %v1863_v7 = vld [vmem:[#allocation8 + $0x50] ss:$8 sps:$4 sm:$0xff]  }
 0x16f   :  { %v296_v14 = vrot.slane %v295_v11, 1  ;;  %v281_v15 = vadd.f32 %v280_v10, %v279_v6  ;;  %v1865_v6 = vld [vmem:[#allocation8 + $0x54] ss:$8 sps:$4 sm:$0xff]   ;;  %v1868_v8 = vld [vmem:[#allocation8 + $0x64] ss:$8 sps:$4 sm:$0xff]  }
 0x170   :  { %v282_v16 = vmul.f32 0.125, %v275_v12  ;;  %v291_v17 = vadd.f32 %v290_v13, %v289_v9  ;;  %v1866_v9 = vld [vmem:[#allocation8 + $0x60] ss:$8 sps:$4 sm:$0xff]   ;;  %v1871_v10 = vld [vmem:[#allocation8 + $0x74] ss:$8 sps:$4 sm:$0xff]  }
 0x171   :  { %v297_v18 = vadd.f32 %v296_v14, %v295_v11  ;;  %v283_v19 = vmul.f32 0.125, %v281_v15  ;;  %920 = vmatpush1.bf16.msra.mxu0 %v1854_v1  ;;  %v1869_v11 = vld [vmem:[#allocation8 + $0x70] ss:$8 sps:$4 sm:$0xff]   ;;  %v1874_v12 = vld [vmem:[#allocation8 + $0x84] ss:$8 sps:$4 sm:$0xff]  }
 0x172   :  { %v298_v20 = vmul.f32 0.125, %v291_v17  ;;  %v300_v21 = vmul.f32 %v282_v16, %v282_v16  ;;  %921 = vmatprep.subr.bf16.mxu0 %v1859_v2  ;;  %v1872_v13 = vld [vmem:[#allocation8 + $0x80] ss:$8 sps:$4 sm:$0xff]   ;;  %v1877_v14 = vld [vmem:[#allocation8 + $0x94] ss:$8 sps:$4 sm:$0xff]  }
 0x173   :  { %v299_v22 = vmul.f32 0.125, %v297_v18  ;;  %v301_v23 = vmul.f32 %v283_v19, %v283_v19  ;;  %v1875_v15 = vld [vmem:[#allocation8 + $0x90] ss:$8 sps:$4 sm:$0xff]   ;;  %v1878_v17 = vld [vmem:[#allocation8 + $0xa0] ss:$8 sps:$4 sm:$0xff]  }
 0x174   :  { %v302_v24 = vsub.f32 %v298_v20, %v300_v21  ;;  %v1883_v18 = vld [vmem:[#allocation8 + $0xb4] ss:$8 sps:$4 sm:$0xff]   ;;  %v1886_v20 = vld [vmem:[#allocation8 + $0xc4] ss:$8 sps:$4 sm:$0xff]   ;;  %v1884_v21 = vld [vmem:[#allocation8 + $0xc0] ss:$8 sps:$4 sm:$0xff]  }
 0x175   :  { %v303_v25 = vsub.f32 %v299_v22, %v301_v23  ;;  %922 = vmatpush1.bf16.msra.mxu0 %v1857_v3  ;;  %v1889_v22 = vld [vmem:[#allocation8 + $0xd4] ss:$8 sps:$4 sm:$0xff]   ;;  %v1887_v23 = vld [vmem:[#allocation8 + $0xd0] ss:$8 sps:$4 sm:$0xff]  }
 0x176   :  { %v305_v26 = vadd.f32 1e-05, %v302_v24  ;;  %923 = vmatprep.subr.bf16.mxu0 %v1862_v4  ;;  %v1892_v24 = vld [vmem:[#allocation8 + $0xe4] ss:$8 sps:$4 sm:$0xff]  }
 0x177   :  { %v306_v27 = vadd.f32 1e-05, %v303_v25  ;;  %v1890_v25 = vld [vmem:[#allocation8 + $0xe0] ss:$8 sps:$4 sm:$0xff]  }
 0x178   :  { %1960 = vrsqrt.f32 %v305_v26  ;;  %v1895_v26 = vld [vmem:[#allocation8 + $0xf4] ss:$8 sps:$4 sm:$0xff]  }
 0x179   :  { %1962 = vrsqrt.f32 %v306_v27  ;;  %924 = vmatpush1.bf16.msra.mxu0 %v1860_v5  ;;  %v1893_v27 = vld [vmem:[#allocation8 + $0xf0] ss:$8 sps:$4 sm:$0xff]  }
 0x17a   :  { %925 = vmatprep.subr.bf16.mxu0 %v1865_v6 }
 0x17d   :  { %926 = vmatpush1.bf16.msra.mxu0 %v1863_v7 }
 0x17e   :  { %927 = vmatprep.subr.bf16.mxu0 %v1868_v8 }
 0x181   :  { %928 = vmatpush1.bf16.msra.mxu0 %v1866_v9 }
 0x182   :  { %v1961_v33 = vpop.eup %1960  ;;  %929 = vmatprep.subr.bf16.mxu0 %v1871_v10 }
 0x183   :  { %v1963_v35 = vpop.eup %1962 }
 0x184   :  { %v311_v36 = vcombine.low %v1961_v33, %v1963_v35 }
 0x185   :  { %930 = vmatpush1.bf16.msra.mxu0 %v1869_v11 }
 0x186   :  { %v318_v37 = vrot.slane %v311_v36, %v2321_v34  ;;  %931 = vmatprep.subr.bf16.mxu0 %v1874_v12 }
 0x188   :  { %v325_v39 = vrot.slane %v318_v37, %v2321_v34 }
 0x189   :  { %932 = vmatpush1.bf16.msra.mxu0 %v1872_v13  ;;  %v647_v13 = vld [vmem:[%s2403_s5] sm:$0x3] }
 0x18a   :  { %v327_v42 = vmul.f32 %v325_v39, %v304_v38  ;;  %933 = vmatprep.subr.bf16.mxu0 %v1877_v14 }
 0x18c   :  { %v333_v43 = vrot.slane %v327_v42, %v2328_v40  ;;  %v337_v44 = vrot.slane %v327_v42, %v2330_v41 }
 0x18d   :  { %934 = vmatpush1.bf16.msra.mxu0 %v1875_v15 }
 0x18e   :  { %v340_v45 = vmul.f32 %v333_v43, %v282_v16  ;;  %v341_v46 = vmul.f32 %v337_v44, %v283_v19  ;;  %v362_v47 = vmul.f32 %v337_v44, %v265_v55  ;;  %v361_v48 = vmul.f32 %v333_v43, %v263_v52  ;;  %v1880_v16 = vld [vmem:[#allocation8 + $0xa4] ss:$8 sps:$4 sm:$0xff]   ;;  %v1881_v19 = vld [vmem:[#allocation8 + $0xb0] ss:$8 sps:$4 sm:$0xff]  }
 0x18f   :  { %935 = vmatprep.subr.bf16.mxu0 %v1880_v16 }
 0x190   :  { %v344_v49 = vcombine.low %v340_v45, %v341_v46 }
 0x191   :  { %936 = vmatpush1.bf16.msra.mxu0 %v1878_v17 }
 0x192   :  { %v351_v50 = vrot.slane %v344_v49, %v2321_v34  ;;  %937 = vmatprep.subr.bf16.mxu0 %v1883_v18 }
 0x194   :  { %v358_v53 = vrot.slane %v351_v50, %v2321_v34 }
 0x195   :  { %938 = vmatpush1.bf16.msra.mxu0 %v1881_v19 }
 0x196   :  { %v360_v54 = vsub.f32 %v328_v51, %v358_v53  ;;  %939 = vmatprep.subr.bf16.mxu0 %v1886_v20 }
 0x198   :  { %v371_v56 = vrot.slane %v360_v54, %v2330_v41  ;;  %v367_v57 = vrot.slane %v360_v54, %v2328_v40 }
 0x199   :  { %940 = vmatpush1.bf16.msra.mxu0 %v1884_v21 }
 0x19a   :  { %v375_v58 = vadd.f32 %v371_v56, %v362_v47  ;;  %v374_v59 = vadd.f32 %v367_v57, %v361_v48  ;;  %941 = vmatprep.subr.bf16.mxu0 %v1889_v22 }
 0x19c   :  { %v377_v60 = vmax.f32 %v375_v58, 0.0  ;;  %v376_v61 = vmax.f32 %v374_v59, 0.0 }
 0x19d   :  { %942 = vmatpush1.bf16.msra.mxu0 %v1887_v23 }
 0x19e   :  { %v379_v55 = vpack.c.bf16 %v377_v60, %v377_v60  ;;  %v378_v52 = vpack.c.bf16 %v376_v61, %v376_v61  ;;  %943 = vmatprep.subr.bf16.mxu0 %v1892_v24  ;;  %v671_v24 = vld [vmem:[%s2404_s6] sm:$0x3] }
 0x1a0   :  { %604 = vmatprep.mubr.bf16.mxu1 %v379_v55 }
 0x1a1   :  { %605 = vmatmul.mubr.bf16.vlgmr.msra.gmra.mrb[0].mxu1 %v378_v52  ;;  %944 = vmatpush1.bf16.msra.mxu0 %v1890_v25 }
 0x1a2   :  { %945 = vmatprep.subr.bf16.mxu0 %v1895_v26  ;;  %1259 = vmatpush1.bf16.msra.mxu1 %v1896_v28 }
 0x1a5   :  { %946 = vmatpush1.bf16.msra.mxu0 %v1893_v27 }
 0x274   :  { %v606_v30 = vpop.f32.mrb[0].mxu1 }
 0x275   :  { %v613_v31 = vrot.slane %v606_v30, 4  ;;  %v627_v32 = vmul.f32 %v606_v30, %v606_v30  ;;  %v608_v33 = vpop.f32.mrb[1].mxu1 }
 0x276   :  { %v619_v35 = vrot.slane %v608_v33, 4  ;;  %v628_v36 = vmul.f32 %v608_v33, %v608_v33  ;;  %v610_v37 = vpop.f32.mrb[2].mxu1 }
 0x277   :  { %v614_v38 = vadd.f32 %v613_v31, %v606_v30  ;;  %v629_v39 = vrot.slane %v627_v32, 4  ;;  %v611_v42 = vpop.f32.mrb[3].mxu1  ;;  %v1899_v37 = vld [vmem:[#allocation10 + $0x10] ss:$8 sps:$4 sm:$0xff]  }
 0x278   :  { %v620_v43 = vadd.f32 %v619_v35, %v608_v33  ;;  %v635_v44 = vrot.slane %v628_v36, 4  ;;  %v1907_v42 = vld [vmem:[#allocation10 + $0x34] ss:$8 sps:$4 sm:$0xff]  }
 0x279   :  { %v615_v45 = vrot.slane %v614_v38, 2  ;;  %v630_v46 = vadd.f32 %v629_v39, %v627_v32  ;;  %v1902_v39 = vld [vmem:[#allocation10 + $0x20] ss:$8 sps:$4 sm:$0xff]  }
 0x27a   :  { %v621_v47 = vrot.slane %v620_v43, 2  ;;  %v636_v48 = vadd.f32 %v635_v44, %v628_v36  ;;  %v1901_v36 = vld [vmem:[#allocation10 + $0x14] ss:$8 sps:$4 sm:$0xff]   ;;  %v1910_v44 = vld [vmem:[#allocation10 + $0x44] ss:$8 sps:$4 sm:$0xff]  }
 0x27b   :  { %v616_v49 = vadd.f32 %v615_v45, %v614_v38  ;;  %v631_v50 = vrot.slane %v630_v46, 2  ;;  %1260 = vmatprep.subr.bf16.mxu1 %v1901_v36  ;;  %v1904_v38 = vld [vmem:[#allocation10 + $0x24] ss:$8 sps:$4 sm:$0xff]   ;;  %v1908_v45 = vld [vmem:[#allocation10 + $0x40] ss:$8 sps:$4 sm:$0xff]  }
 0x27c   :  { %v622_v51 = vadd.f32 %v621_v47, %v620_v43  ;;  %v637_v53 = vrot.slane %v636_v48, 2  ;;  %1261 = vmatpush1.bf16.msra.mxu1 %v1899_v37  ;;  %v1905_v43 = vld [vmem:[#allocation10 + $0x30] ss:$8 sps:$4 sm:$0xff]  }
 0x27d   :  { %v617_v54 = vrot.slane %v616_v49, 1  ;;  %v632_v56 = vadd.f32 %v631_v50, %v630_v46  ;;  %1262 = vmatprep.subr.bf16.mxu1 %v1904_v38  ;;  %v1913_v46 = vld [vmem:[#allocation10 + $0x54] ss:$8 sps:$4 sm:$0xff]   ;;  %v1911_v47 = vld [vmem:[#allocation10 + $0x50] ss:$8 sps:$4 sm:$0xff]  }
 0x27e   :  { %v623_v57 = vrot.slane %v622_v51, 1  ;;  %v638_v58 = vadd.f32 %v637_v53, %v636_v48  ;;  %v1916_v48 = vld [vmem:[#allocation10 + $0x64] ss:$8 sps:$4 sm:$0xff]   ;;  %v1919_v50 = vld [vmem:[#allocation10 + $0x74] ss:$8 sps:$4 sm:$0xff]  }
 0x27f   :  { %v618_v59 = vadd.f32 %v617_v54, %v616_v49  ;;  %v633_v60 = vrot.slane %v632_v56, 1  ;;  %v1914_v49 = vld [vmem:[#allocation10 + $0x60] ss:$8 sps:$4 sm:$0xff]   ;;  %v1922_v53 = vld [vmem:[#allocation10 + $0x84] ss:$8 sps:$4 sm:$0xff]  }
 0x280   :  { %v624_v61 = vadd.f32 %v623_v57, %v622_v51  ;;  %v639_v55 = vrot.slane %v638_v58, 1  ;;  %1263 = vmatpush1.bf16.msra.mxu1 %v1902_v39  ;;  %v1917_v51 = vld [vmem:[#allocation10 + $0x70] ss:$8 sps:$4 sm:$0xff]   ;;  %v1920_v54 = vld [vmem:[#allocation10 + $0x80] ss:$8 sps:$4 sm:$0xff]  }
 0x281   :  { %v625_v52 = vmul.f32 0.125, %v618_v59  ;;  %v634_v62 = vadd.f32 %v633_v60, %v632_v56  ;;  %1264 = vmatprep.subr.bf16.mxu1 %v1907_v42  ;;  %v1925_v56 = vld [vmem:[#allocation10 + $0x94] ss:$8 sps:$4 sm:$0xff]   ;;  %v1923_v57 = vld [vmem:[#allocation10 + $0x90] ss:$8 sps:$4 sm:$0xff]  }
 0x282   :  { %v626_v63 = vmul.f32 0.125, %v624_v61  ;;  %v640_v0 = vadd.f32 %v639_v55, %v638_v58  ;;  %v1928_v58 = vld [vmem:[#allocation10 + $0xa4] ss:$8 sps:$4 sm:$0xff]   ;;  %v1926_v59 = vld [vmem:[#allocation10 + $0xa0] ss:$8 sps:$4 sm:$0xff]  }
 0x283   :  { %v641_v1 = vmul.f32 0.125, %v634_v62  ;;  %v643_v2 = vmul.f32 %v625_v52, %v625_v52  ;;  %v1931_v60 = vld [vmem:[#allocation10 + $0xb4] ss:$8 sps:$4 sm:$0xff]   ;;  %v1929_v61 = vld [vmem:[#allocation10 + $0xb0] ss:$8 sps:$4 sm:$0xff]  }
 0x284   :  { %v642_v3 = vmul.f32 0.125, %v640_v0  ;;  %v644_v4 = vmul.f32 %v626_v63, %v626_v63  ;;  %1265 = vmatpush1.bf16.msra.mxu1 %v1905_v43  ;;  %v1934_v55 = vld [vmem:[#allocation10 + $0xc4] ss:$8 sps:$4 sm:$0xff]   ;;  %v1937_v62 = vld [vmem:[#allocation10 + $0xd4] ss:$8 sps:$4 sm:$0xff]  }
 0x285   :  { %v645_v5 = vsub.f32 %v641_v1, %v643_v2  ;;  %1266 = vmatprep.subr.bf16.mxu1 %v1910_v44  ;;  %v1940_v0 = vld [vmem:[#allocation10 + $0xe4] ss:$8 sps:$4 sm:$0xff]   ;;  %v1938_v1 = vld [vmem:[#allocation10 + $0xe0] ss:$8 sps:$4 sm:$0xff]   ;;  %v1943_v2 = vld [vmem:[#allocation10 + $0xf4] ss:$8 sps:$4 sm:$0xff]  }
 0x286   :  { %v646_v6 = vsub.f32 %v642_v3, %v644_v4  ;;  %v1941_v3 = vld [vmem:[#allocation10 + $0xf0] ss:$8 sps:$4 sm:$0xff]  }
 0x287   :  { %v648_v7 = vadd.f32 1e-05, %v645_v5 }
 0x288   :  { %v649_v8 = vadd.f32 1e-05, %v646_v6  ;;  %1267 = vmatpush1.bf16.msra.mxu1 %v1908_v45 }
 0x289   :  { %1964 = vrsqrt.f32 %v648_v7  ;;  %1268 = vmatprep.subr.bf16.mxu1 %v1913_v46 }
 0x28a   :  { %1966 = vrsqrt.f32 %v649_v8 }
 0x28c   :  { %1269 = vmatpush1.bf16.msra.mxu1 %v1911_v47 }
 0x28d   :  { %1270 = vmatprep.subr.bf16.mxu1 %v1916_v48 }
 0x290   :  { %1271 = vmatpush1.bf16.msra.mxu1 %v1914_v49 }
 0x291   :  { %1272 = vmatprep.subr.bf16.mxu1 %v1919_v50 }
 0x293   :  { %v1965_v9 = vpop.eup %1964 }
 0x294   :  { %v1967_v10 = vpop.eup %1966  ;;  %1273 = vmatpush1.bf16.msra.mxu1 %v1917_v51  ;;  %v990_v51 = vld [vmem:[%s2406_s8] sm:$0x3] }
 0x295   :  { %v654_v11 = vcombine.low %v1965_v9, %v1967_v10  ;;  %1274 = vmatprep.subr.bf16.mxu1 %v1922_v53 }
 0x297   :  { %v661_v12 = vrot.slane %v654_v11, %v2321_v34 }
 0x298   :  { %1275 = vmatpush1.bf16.msra.mxu1 %v1920_v54 }
 0x299   :  { %v668_v14 = vrot.slane %v661_v12, %v2321_v34  ;;  %1276 = vmatprep.subr.bf16.mxu1 %v1925_v56 }
 0x29b   :  { %v670_v15 = vmul.f32 %v668_v14, %v647_v13 }
 0x29c   :  { %1277 = vmatpush1.bf16.msra.mxu1 %v1923_v57 }
 0x29d   :  { %v676_v16 = vrot.slane %v670_v15, %v2328_v40  ;;  %v680_v17 = vrot.slane %v670_v15, %v2330_v41  ;;  %1278 = vmatprep.subr.bf16.mxu1 %v1928_v58 }
 0x29f   :  { %v683_v18 = vmul.f32 %v676_v16, %v625_v52  ;;  %v684_v19 = vmul.f32 %v680_v17, %v626_v63  ;;  %v705_v20 = vmul.f32 %v680_v17, %v608_v33  ;;  %v704_v21 = vmul.f32 %v676_v16, %v606_v30  ;;  %v1932_v52 = vld [vmem:[#allocation10 + $0xc0] ss:$8 sps:$4 sm:$0xff]   ;;  %v1935_v63 = vld [vmem:[#allocation10 + $0xd0] ss:$8 sps:$4 sm:$0xff]  }
 0x2a0   :  { %1279 = vmatpush1.bf16.msra.mxu1 %v1926_v59 }
 0x2a1   :  { %v687_v22 = vcombine.low %v683_v18, %v684_v19  ;;  %1280 = vmatprep.subr.bf16.mxu1 %v1931_v60 }
 0x2a3   :  { %v694_v23 = vrot.slane %v687_v22, %v2321_v34 }
 0x2a4   :  { %1281 = vmatpush1.bf16.msra.mxu1 %v1929_v61 }
 0x2a5   :  { %v701_v25 = vrot.slane %v694_v23, %v2321_v34  ;;  %1282 = vmatprep.subr.bf16.mxu1 %v1934_v55 }
 0x2a7   :  { %v703_v26 = vsub.f32 %v671_v24, %v701_v25 }
 0x2a8   :  { %1283 = vmatpush1.bf16.msra.mxu1 %v1932_v52 }
 0x2a9   :  { %v714_v27 = vrot.slane %v703_v26, %v2330_v41  ;;  %v710_v28 = vrot.slane %v703_v26, %v2328_v40  ;;  %1284 = vmatprep.subr.bf16.mxu1 %v1937_v62  ;;  %v1014_v62 = vld [vmem:[%s2407_s9] sm:$0x3] }
 0x2ab   :  { %v718_v29 = vadd.f32 %v714_v27, %v705_v20  ;;  %v717_v31 = vadd.f32 %v710_v28, %v704_v21 }
 0x2ac   :  { %1285 = vmatpush1.bf16.msra.mxu1 %v1935_v63 }
 0x2ad   :  { %v720_v32 = vmax.f32 %v718_v29, 0.0  ;;  %v719_v35 = vmax.f32 %v717_v31, 0.0  ;;  %1286 = vmatprep.subr.bf16.mxu1 %v1940_v0 }
 0x2af   :  { %v722_v33 = vpack.c.bf16 %v720_v32, %v720_v32  ;;  %v721_v30 = vpack.c.bf16 %v719_v35, %v719_v35 }
 0x2b0   :  { %1287 = vmatpush1.bf16.msra.mxu1 %v1938_v1 }
 0x2b1   :  { %947 = vmatprep.mubr.bf16.mxu0 %v722_v33  ;;  %1288 = vmatprep.subr.bf16.mxu1 %v1943_v2 }
 0x2b2   :  { %948 = vmatmul.mubr.bf16.vlgmr.msra.gmra.mrb[4].mxu0 %v721_v30 }
 0x2b4   :  { %1289 = vmatpush1.bf16.msra.mxu1 %v1941_v3 }
 0x385   :  { %v949_v4 = vpop.f32.mrb[4].mxu0 }
 0x386   :  { %v956_v5 = vrot.slane %v949_v4, 4  ;;  %v970_v6 = vmul.f32 %v949_v4, %v949_v4  ;;  %v951_v7 = vpop.f32.mrb[5].mxu0 }
 0x387   :  { %v962_v8 = vrot.slane %v951_v7, 4  ;;  %v971_v9 = vmul.f32 %v951_v7, %v951_v7  ;;  %v953_v10 = vpop.f32.mrb[6].mxu0 }
 0x388   :  { %v957_v11 = vadd.f32 %v956_v5, %v949_v4  ;;  %v972_v12 = vrot.slane %v970_v6, 4  ;;  %v954_v13 = vpop.f32.mrb[7].mxu0  ;;  %v1945_v10 = vld [vmem:[#allocation11] sm:$0xff]  }
 0x389   :  { %v963_v14 = vadd.f32 %v962_v8, %v951_v7  ;;  %v978_v15 = vrot.slane %v971_v9, 4  ;;  %v1948_v13 = vld [vmem:[#allocation11 + $0x50] sm:$0xff]  }
 0x38a   :  { %v958_v16 = vrot.slane %v957_v11, 2  ;;  %v973_v17 = vadd.f32 %v972_v12, %v970_v6  ;;  %v1947_v12 = vld [vmem:[#allocation11 + $0x8] sm:$0xff]  }
 0x38b   :  { %v964_v18 = vrot.slane %v963_v14, 2  ;;  %v979_v19 = vadd.f32 %v978_v15, %v971_v9  ;;  %v1944_v9 = vld [vmem:[#allocation11 + $0x40] sm:$0xff]   ;;  %v1950_v15 = vld [vmem:[#allocation11 + $0x58] sm:$0xff]  }
 0x38c   :  { %v959_v20 = vadd.f32 %v958_v16, %v957_v11  ;;  %v974_v21 = vrot.slane %v973_v17, 2  ;;  %1741 = vmatprep.subr.bf16.mxu0 %v1944_v9  ;;  %v1946_v11 = vld [vmem:[#allocation11 + $0x48] sm:$0xff]   ;;  %v1951_v16 = vld [vmem:[#allocation11 + $0x18] sm:$0xff]  }
 0x38d   :  { %v965_v22 = vadd.f32 %v964_v18, %v963_v14  ;;  %v980_v23 = vrot.slane %v979_v19, 2  ;;  %1742 = vmatpush3.bf16.msra.mxu0 %v1945_v10  ;;  %v1949_v14 = vld [vmem:[#allocation11 + $0x10] sm:$0xff]   ;;  %v1953_v18 = vld [vmem:[#allocation11 + $0x20] sm:$0xff]  }
 0x38e   :  { %v960_v24 = vrot.slane %v959_v20, 1  ;;  %v975_v25 = vadd.f32 %v974_v21, %v973_v17  ;;  %1743 = vmatprep.subr.bf16.mxu0 %v1946_v11  ;;  %v1952_v17 = vld [vmem:[#allocation11 + $0x60] sm:$0xff]   ;;  %v1956_v21 = vld [vmem:[#allocation11 + $0x70] sm:$0xff]  }
 0x38f   :  { %v966_v26 = vrot.slane %v965_v22, 1  ;;  %v981_v27 = vadd.f32 %v980_v23, %v979_v19  ;;  %v1954_v19 = vld [vmem:[#allocation11 + $0x68] sm:$0xff]   ;;  %v1958_v23 = vld [vmem:[#allocation11 + $0x78] sm:$0xff]  }
 0x390   :  { %v961_v28 = vadd.f32 %v960_v24, %v959_v20  ;;  %v976_v29 = vrot.slane %v975_v25, 1  ;;  %v1955_v20 = vld [vmem:[#allocation11 + $0x28] sm:$0xff]   ;;  %v1959_v24 = vld [vmem:[#allocation11 + $0x38] sm:$0xff]  }
 0x391   :  { %v967_v31 = vadd.f32 %v966_v26, %v965_v22  ;;  %v982_v32 = vrot.slane %v981_v27, 1  ;;  %1744 = vmatpush3.bf16.msra.mxu0 %v1947_v12  ;;  %v1957_v22 = vld [vmem:[#allocation11 + $0x30] sm:$0xff]  }
 0x392   :  { %v968_v35 = vmul.f32 0.125, %v961_v28  ;;  %v977_v33 = vadd.f32 %v976_v29, %v975_v25  ;;  %1745 = vmatprep.subr.bf16.mxu0 %v1948_v13 }
 0x393   :  { %v969_v30 = vmul.f32 0.125, %v967_v31  ;;  %v983_v36 = vadd.f32 %v982_v32, %v981_v27 }
 0x394   :  { %v984_v37 = vmul.f32 0.125, %v977_v33  ;;  %v986_v38 = vmul.f32 %v968_v35, %v968_v35 }
 0x395   :  { %v985_v39 = vmul.f32 0.125, %v983_v36  ;;  %v987_v42 = vmul.f32 %v969_v30, %v969_v30  ;;  %1746 = vmatpush3.bf16.msra.mxu0 %v1949_v14 }
 0x396   :  { %v988_v43 = vsub.f32 %v984_v37, %v986_v38  ;;  %1747 = vmatprep.subr.bf16.mxu0 %v1950_v15 }
 0x397   :  { %v989_v44 = vsub.f32 %v985_v39, %v987_v42 }
 0x398   :  { %v991_v45 = vadd.f32 1e-05, %v988_v43 }
 0x399   :  { %v992_v46 = vadd.f32 1e-05, %v989_v44  ;;  %1748 = vmatpush3.bf16.msra.mxu0 %v1951_v16 }
 0x39a   :  { %1968 = vrsqrt.f32 %v991_v45  ;;  %1749 = vmatprep.subr.bf16.mxu0 %v1952_v17 }
 0x39b   :  { %1970 = vrsqrt.f32 %v992_v46 }
 0x39d   :  { %1750 = vmatpush3.bf16.msra.mxu0 %v1953_v18 }
 0x39e   :  { %1751 = vmatprep.subr.bf16.mxu0 %v1954_v19  ;;  %v1357_v19 = vld [vmem:[%s2410_s12] sm:$0x3]  ;;  %s2156_s12 = smov [#allocation13]  }
 0x39f   :  { %s1600_s23 = sshll.u32 %s2156_s12, 4  ;;  %s1601_s23 = int_to_ptr.vmem [resolvable:$true] %s1600_s23 }
 0x3a0   :  { %p2117_p7 = scmp.lt.s32.totalorder %s1601_s23, %s1601_s23 }
 0x3a1   :  { %1752 = vmatpush3.bf16.msra.mxu0 %v1955_v20 }
 0x3a2   :  { %1753 = vmatprep.subr.bf16.mxu0 %v1956_v21 }
 0x3a4   :  { %v1969_v47 = vpop.eup %1968 }
 0x3a5   :  { %v1971_v48 = vpop.eup %1970  ;;  %1754 = vmatpush3.bf16.msra.mxu0 %v1957_v22 }
 0x3a6   :  { %v997_v49 = vcombine.low %v1969_v47, %v1971_v48  ;;  %1755 = vmatprep.subr.bf16.mxu0 %v1958_v23 }
 0x3a8   :  { %v1004_v50 = vrot.slane %v997_v49, %v2321_v34 }
 0x3a9   :  { %1756 = vmatpush3.bf16.msra.mxu0 %v1959_v24 }
 0x3aa   :  { %v1011_v53 = vrot.slane %v1004_v50, %v2321_v34 }
 0x3ac   :  { %v1013_v54 = vmul.f32 %v1011_v53, %v990_v51 }
 0x3ae   :  { %v1019_v56 = vrot.slane %v1013_v54, %v2328_v40  ;;  %v1023_v57 = vrot.slane %v1013_v54, %v2330_v41 }
 0x3b0   :  { %v1026_v58 = vmul.f32 %v1019_v56, %v968_v35  ;;  %v1027_v59 = vmul.f32 %v1023_v57, %v969_v30  ;;  %v1048_v60 = vmul.f32 %v1023_v57, %v951_v7  ;;  %v1047_v61 = vmul.f32 %v1019_v56, %v949_v4 }
 0x3b2   :  { %v1030_v55 = vcombine.low %v1026_v58, %v1027_v59 }
 0x3b4   :  { %v1037_v52 = vrot.slane %v1030_v55, %v2321_v34 }
 0x3b6   :  { %v1044_v63 = vrot.slane %v1037_v52, %v2321_v34 }
 0x3b8   :  { %v1046_v0 = vsub.f32 %v1014_v62, %v1044_v63 }
 0x3ba   :  { %v1057_v1 = vrot.slane %v1046_v0, %v2330_v41  ;;  %v1053_v2 = vrot.slane %v1046_v0, %v2328_v40 }
 0x3bc   :  { %v1061_v3 = vadd.f32 %v1057_v1, %v1048_v60  ;;  %v1060_v5 = vadd.f32 %v1053_v2, %v1047_v61 }
 0x3be   :  { %v1063_v6 = vmax.f32 %v1061_v3, 0.0  ;;  %v1062_v8 = vmax.f32 %v1060_v5, 0.0 }
 0x3c0   :  { %v1065_v7 = vpack.c.bf16 %v1063_v6, %v1063_v6  ;;  %v1064_v4 = vpack.c.bf16 %v1062_v8, %v1062_v8 }
 0x3c2   :  { %1290 = vmatprep.mubr.bf16.mxu1 %v1065_v7 }
 0x3c3   :  { %1291 = vmatmul.mubr.bf16.vlgmr.msra.gmra.mrb[4].mxu1 %v1064_v4  ;;  %v1333_v4 = vld [vmem:[%s2409_s11] sm:$0x3] }
 0x496   :  { %v1292_v25 = vpop.f32.mrb[4].mxu1 }
 0x497   :  { %v1299_v26 = vrot.slane %v1292_v25, 4  ;;  %v1313_v27 = vmul.f32 %v1292_v25, %v1292_v25  ;;  %v1294_v28 = vpop.f32.mrb[5].mxu1 }
 0x498   :  { %v1305_v29 = vrot.slane %v1294_v28, 4  ;;  %v1314_v31 = vmul.f32 %v1294_v28, %v1294_v28  ;;  %v1296_v32 = vpop.f32.mrb[6].mxu1 }
 0x499   :  { %v1300_v35 = vadd.f32 %v1299_v26, %v1292_v25  ;;  %v1315_v33 = vrot.slane %v1313_v27, 4  ;;  %v1297_v30 = vpop.f32.mrb[7].mxu1 }
 0x49a   :  { %v1306_v36 = vadd.f32 %v1305_v29, %v1294_v28  ;;  %v1321_v37 = vrot.slane %v1314_v31, 4 }
 0x49b   :  { %v1301_v38 = vrot.slane %v1300_v35, 2  ;;  %v1316_v39 = vadd.f32 %v1315_v33, %v1313_v27 }
 0x49c   :  { %v1307_v42 = vrot.slane %v1306_v36, 2  ;;  %v1322_v43 = vadd.f32 %v1321_v37, %v1314_v31 }
 0x49d   :  { %v1302_v44 = vadd.f32 %v1301_v38, %v1300_v35  ;;  %v1317_v45 = vrot.slane %v1316_v39, 2  ;;  %v1724_v35 = vld [vmem:[%s2412_s14] ss:$0 sm:$0xff]  ;;  %s2112_s14 = scalar_lea.vmem %s1601_s23, 128 }
 0x49e   :  { %v1308_v46 = vadd.f32 %v1307_v42, %v1306_v36  ;;  %v1323_v47 = vrot.slane %v1322_v43, 2  ;;  %p2113_p6 = scmp.ne.s32.totalorder %s1601_s23, %s2112_s14  ;;  %p2118_p8 = scmp.lt.s32.totalorder %s2112_s14, %s2112_s14 }
 0x49f   :  { %v1303_v48 = vrot.slane %v1302_v44, 1  ;;  %v1318_v49 = vadd.f32 %v1317_v45, %v1316_v39 }
 0x4a0   :  { %v1309_v50 = vrot.slane %v1308_v46, 1  ;;  %v1324_v51 = vadd.f32 %v1323_v47, %v1322_v43  ;;  %p2119_p9 = por %p2118_p8, %p2117_p7 }
 0x4a1   :  { %v1304_v53 = vadd.f32 %v1303_v48, %v1302_v44  ;;  %v1319_v54 = vrot.slane %v1318_v49, 1 }
 0x4a2   :  { %v1310_v56 = vadd.f32 %v1309_v50, %v1308_v46  ;;  %v1325_v57 = vrot.slane %v1324_v51, 1  ;;  %p2120_p10 = pnand %p2119_p9, %p2113_p6 }
 0x4a3   :  { %v1311_v58 = vmul.f32 0.125, %v1304_v53  ;;  %v1320_v59 = vadd.f32 %v1319_v54, %v1318_v49 }
 0x4a4   :  { %v1312_v60 = vmul.f32 0.125, %v1310_v56  ;;  %v1326_v61 = vadd.f32 %v1325_v57, %v1324_v51 }
 0x4a5   :  { %v1327_v55 = vmul.f32 0.125, %v1320_v59  ;;  %v1329_v52 = vmul.f32 %v1311_v58, %v1311_v58 }
 0x4a6   :  { %v1328_v62 = vmul.f32 0.125, %v1326_v61  ;;  %v1330_v63 = vmul.f32 %v1312_v60, %v1312_v60 }
 0x4a7   :  { %v1331_v0 = vsub.f32 %v1327_v55, %v1329_v52 }
 0x4a8   :  { %v1332_v1 = vsub.f32 %v1328_v62, %v1330_v63 }
 0x4a9   :  { %v1334_v2 = vadd.f32 1e-05, %v1331_v0 }
 0x4aa   :  { %v1335_v3 = vadd.f32 1e-05, %v1332_v1 }
 0x4ab   :  { %1972 = vrsqrt.f32 %v1334_v2 }
 0x4ac   :  { %1974 = vrsqrt.f32 %v1335_v3 }
 0x4b5   :  { %v1973_v5 = vpop.eup %1972 }
 0x4b6   :  { %v1975_v6 = vpop.eup %1974 }
 0x4b7   :  { %v1340_v8 = vcombine.low %v1973_v5, %v1975_v6 }
 0x4b9   :  { %v1347_v7 = vrot.slane %v1340_v8, %v2321_v34 }
 0x4bb   :  { %v1354_v9 = vrot.slane %v1347_v7, %v2321_v34 }
 0x4bd   :  { %v1356_v10 = vmul.f32 %v1354_v9, %v1333_v4 }
 0x4bf   :  { %v1362_v11 = vrot.slane %v1356_v10, %v2328_v40  ;;  %v1366_v12 = vrot.slane %v1356_v10, %v2330_v41 }
 0x4c1   :  { %v1369_v13 = vmul.f32 %v1362_v11, %v1311_v58  ;;  %v1370_v14 = vmul.f32 %v1366_v12, %v1312_v60  ;;  %v1391_v15 = vmul.f32 %v1366_v12, %v1294_v28  ;;  %v1390_v16 = vmul.f32 %v1362_v11, %v1292_v25 }
 0x4c3   :  { %v1373_v17 = vcombine.low %v1369_v13, %v1370_v14 }
 0x4c5   :  { %v1380_v18 = vrot.slane %v1373_v17, %v2321_v34 }
 0x4c7   :  { %v1387_v20 = vrot.slane %v1380_v18, %v2321_v34 }
 0x4c9   :  { %v1389_v21 = vsub.f32 %v1357_v19, %v1387_v20 }
 0x4cb   :  { %v1400_v22 = vrot.slane %v1389_v21, %v2330_v41  ;;  %v1396_v23 = vrot.slane %v1389_v21, %v2328_v40 }
 0x4cd   :  { %v1404_v24 = vadd.f32 %v1400_v22, %v1391_v15  ;;  %v1403_v26 = vadd.f32 %v1396_v23, %v1390_v16 }
 0x4cf   :  { %v1406_v27 = vmax.f32 %v1404_v24, 0.0  ;;  %v1405_v29 = vmax.f32 %v1403_v26, 0.0 }
 0x4d1   :  { %v1408_v28 = vpack.c.bf16 %v1406_v27, %v1406_v27  ;;  %v1407_v25 = vpack.c.bf16 %v1405_v29, %v1405_v29 }
 0x4d3   :  { %1576 = vmatprep.mubr.bf16.mxu0 %v1408_v28 }
 0x4d4   :  { %1577 = vmatmul.mubr.bf16.vlgmr.msra.gmra.mrb[8].mxu0 %v1407_v25 }
 0x5a7   :  { %v1757_v31 = vpop.f32.mrb[8].mxu0 }
 0x5a8   :  { %v1758_v32 = vpop.f32.mrb[9].mxu0 }
 0x5a9   :  { %v1759_v34 = vadd.f32 %v1758_v32, %v1757_v31  ;;  %v1760_v33 = vpop.f32.mrb[10].mxu0 }
 0x5aa   :  { %v1761_v30 = vpop.f32.mrb[11].mxu0 }
 0x5ab   :  { %v1579_v41 = vadd.f32 %v1759_v34, %v1724_v35 }
 0x5ad   :  { %1584 = vmax.xlane.f32.xlu0 %v1579_v41 }
 0x63a   :  { %v1585_v40 = vpop.xlane.xlu0 %1584 }
 0x63b   :  { %v1586_v36 = vsub.f32 %v1579_v41, %v1585_v40 }
 0x63d   :  { %v1587_v37 = vmul.f32 1.442695, %v1586_v36 }
 0x63f   :  { %1976 = vpow2.f32 %v1587_v37 }
 0x649   :  { %v1977_v38 = vpop.eup %1976 }
 0x64a   :  { %1589 = vadd.xlane.f32.xlu0 %v1977_v38 }
 0x6d7   :  { %v1590_v39 = vpop.xlane.xlu0 %1589 }
 0x6d8   :  { %1978 = vrcp.f32 %v1590_v39 }
 0x6e2   :  { %v1979_v42 = vpop.eup %1978 }
 0x6e3   :  { %v1592_v43 = vmul.f32 %v1979_v42, %v1977_v38 }
 0x6e5   :  { %1593 = vst [vmem:[#allocation13] sm:$0xff] %v1592_v43 }
 0x6e6   :  { %2123 = shalt.err (!%p2120_p10)
}
 0x6e7   :  { %s2416_s24 = sld [smem:[#allocation19_spill]] }
 0x6ed   :  { %s2124_s25 = scalar_lea.hbm %s2416_s24, 128 }
 0x6ee   :  { %p2125_p11 = scmp.ne.s32.totalorder %s2416_s24, %s2124_s25  ;;  %p2128_p12 = scmp.lt.u32.totalorder %s2124_s25, %s2416_s24 }
 0x6f0   :  { %p2130_p13 = pnand %p2128_p12, %p2125_p11 }
 0x6f2   :  { %2133 = shalt.err (!%p2130_p13)
}
 0x6f3   :  { %1603 = dma.vmem_to_hbm [thread:$0]  %s1601_s23, 128, %s2416_s24, [#allocation4]  }
 0x6f4   :  { %2142 = dma.done.wait [#allocation4], 128  }
 0x6f5   :  { %2143 = vsyncadd [#allocation4], 4294967168 }
 0x6f6   :  { %1607 = vsyncpa [#allocation3], 1 }
 0x6f7   :  { %1608 = vsyncpa [#allocation6], 1 }
 0x6f8   :  { %1609 = vsyncpa [#allocation9], 1 }
 0x6f9   :  { %1610 = vsyncpa [#allocation12], 1 }
 0x6fa   :  { %1611 = vsyncpa [#allocation4], 1 }

</bundles_post_ra>
